<compile_context>
chip_gen: v7x
topology: tpu7x:2x2x1
jax: 0.10.0
libtpu: 0.0.40
codegen_flags: <defaults>
</compile_context>

<pallas_src>
import math

import jax
import jax.numpy as jnp
from jax.experimental import pallas as pl
from jax.experimental.pallas import tpu as pltpu


_LANE = 128
_MAX_TILE_P1 = 1024            # row tile cap for pass 1 (X @ W)
_MAX_TILE_P2 = 512             # row / K tile cap for pass 2 (A @ support)
_ROW_TILE_BUDGET = 16 << 20    # bytes allowed for the per-row-tile working set
_RESIDENT_SUPPORT_BYTES = 12 << 20   # per-buffer cap (x2 buffers ~= 24 MiB, v7x-safe)
_VMEM_LIMIT = 48 << 20         # scoped VMEM request (<= v7x 64 MiB physical)


def _round_up(x, m):
    return ((x + m - 1) // m) * m


def _pick_tile(dim_pad, cap, balance):
    """Largest tile in {1024,512,256,128} <= cap dividing dim_pad."""
    tile = _LANE
    for t in (1024, 512, 256, 128):
        if t <= cap and dim_pad % t == 0:
            tile = t
            break
    tile = min(tile, dim_pad)
    # Keep >= 2 row tiles when possible so both TensorCores (v7x) get work.
    if balance and dim_pad // tile == 1 and tile >= 256:
        tile //= 2
    return tile


def _row_cap(bytes_per_row):
    """Largest row-tile (multiple of 128) whose blocks fit the row budget."""
    cap = _ROW_TILE_BUDGET // max(bytes_per_row, 1)
    return max(_LANE, (cap // _LANE) * _LANE)


# --------------------- Pass 1: support = X @ W ---------------------
def _xw_kernel(x_ref, w_ref, s_ref):
    # x may arrive as f32 (unpadded fast path) -> cast on the tile (VPU).
    s_ref[...] = jnp.dot(
        x_ref[...].astype(jnp.bfloat16), w_ref[...],
        preferred_element_type=jnp.float32,
    ).astype(s_ref.dtype)


def _compute_support(xp, wp, tm):
    n_pad = xp.shape[0]
    in_pad, out_pad = wp.shape
    return pl.pallas_call(
        _xw_kernel,
        out_shape=jax.ShapeDtypeStruct((n_pad, out_pad), jnp.bfloat16),
        grid_spec=pltpu.PrefetchScalarGridSpec(
            num_scalar_prefetch=0,
            grid=(n_pad // tm,),
            in_specs=[
                pl.BlockSpec((tm, in_pad), lambda i: (i, 0)),
                pl.BlockSpec((in_pad, out_pad), lambda i: (0, 0)),  # W resident
            ],
            out_specs=pl.BlockSpec((tm, out_pad), lambda i: (i, 0)),
        ),
        compiler_params=pltpu.CompilerParams(
            dimension_semantics=("parallel",),
            vmem_limit_bytes=_VMEM_LIMIT,
        ),
    )(xp, wp)


# --------------- Pass 2: out = A @ support (+ bias) ----------------
def _make_pass2_kernel(resident, has_bias):
    def kernel(*refs):
        if has_bias:
            adj_ref, s_ref, b_ref, o_ref = refs
        else:
            adj_ref, s_ref, o_ref = refs
            b_ref = None

        k = pl.program_id(1)
        tk = adj_ref.shape[1]

        if resident:
            # Whole support is VMEM-resident; slice the K block dynamically.
            ks = pl.multiple_of(k * tk, tk)
            s_blk = s_ref[pl.ds(ks, tk), :]
        else:
            s_blk = s_ref[...]

        part = jnp.dot(
            adj_ref[...].astype(jnp.bfloat16), s_blk,
            preferred_element_type=jnp.float32,
        )

        # Output block is resident across the K axis -> accumulate in place.
        @pl.when(k == 0)
        def _():
            o_ref[...] = part

        @pl.when(k > 0)
        def _():
            o_ref[...] += part

        if has_bias:
            @pl.when(k == pl.num_programs(1) - 1)
            def _():
                o_ref[...] += b_ref[...]

    return kernel


def _compute_output(adjp, support, bias_pad, tm, tk, resident):
    n_pad = adjp.shape[0]
    out_pad = support.shape[1]
    grid = (n_pad // tm, n_pad // tk)

    adj_spec = pl.BlockSpec((tm, tk), lambda i, k: (i, k))
    if resident:
        # Constant block index -> DMA'd once, stays in VMEM for the whole grid.
        sup_spec = pl.BlockSpec((n_pad, out_pad), lambda i, k: (0, 0))
    else:
        sup_spec = pl.BlockSpec((tk, out_pad), lambda i, k: (k, 0))
    out_spec = pl.BlockSpec((tm, out_pad), lambda i, k: (i, 0))

    has_bias = bias_pad is not None
    in_specs = [adj_spec, sup_spec]
    args = [adjp, support]
    if has_bias:
        in_specs.append(pl.BlockSpec((1, out_pad), lambda i, k: (0, 0)))
        args.append(bias_pad)

    return pl.pallas_call(
        _make_pass2_kernel(resident, has_bias),
        out_shape=jax.ShapeDtypeStruct((n_pad, out_pad), jnp.float32),
        grid_spec=pltpu.PrefetchScalarGridSpec(
            num_scalar_prefetch=0,
            grid=grid,
            in_specs=in_specs,
            out_specs=out_spec,
        ),
        compiler_params=pltpu.CompilerParams(
            dimension_semantics=("parallel", "arbitrary"),
            vmem_limit_bytes=_VMEM_LIMIT,
        ),
    )(*args)


# --------------------------- Wrapper --------------------------------
def graph_convolution(x, adj, weight, bias=None):
    """GCN layer: (adj @ (x @ weight)) + bias, as two tiled Pallas kernels.

    x:      [N, in_features]  float32
    adj:    [N, N]            float32 (dense adjacency; spmm treated as dense)
    weight: [in_features, out_features]
    bias:   [out_features] or None
    """
    n, in_f = x.shape
    out_f = weight.shape[1]
    out_dtype = x.dtype

    n_pad = _round_up(n, _LANE)
    in_pad = _round_up(in_f, _LANE)
    out_pad = _round_up(out_f, _LANE)

    # Pad only when needed. When padding we fuse the bf16 cast into the same
    # pass (read f32, write bf16); otherwise feed raw f32 and cast in-kernel.
    if (n_pad, in_pad) == (n, in_f):
        xp = x
    else:
        xp = jnp.pad(x.astype(jnp.bfloat16),
                     ((0, n_pad - n), (0, in_pad - in_f)))

    if n_pad == n:
        adjp = adj
    else:
        adjp = jnp.pad(adj.astype(jnp.bfloat16),
                       ((0, n_pad - n), (0, n_pad - n)))

    wp = weight.astype(jnp.bfloat16)
    if (in_pad, out_pad) != (in_f, out_f):
        wp = jnp.pad(wp, ((0, in_pad - in_f), (0, out_pad - out_f)))

    bias_pad = None
    if bias is not None:
        bias_pad = bias.astype(jnp.float32).reshape(1, out_f)
        if out_pad != out_f:
            bias_pad = jnp.pad(bias_pad, ((0, 0), (0, out_pad - out_f)))

    # ---- Pass 1 tiling: W resident, stream X/support row tiles. ----
    p1_bytes_per_row = in_pad * 8 + out_pad * 4      # X (<=f32, x2 bufs) + S (bf16, x2)
    tm1 = _pick_tile(n_pad, min(_MAX_TILE_P1, _row_cap(p1_bytes_per_row)),
                     balance=True)
    support = _compute_support(xp, wp, tm1)           # [n_pad, out_pad] bf16

    # ---- Pass 2 tiling: adjacency row x K grid, resident support if it fits. ----
    tk2 = _pick_tile(n_pad, _MAX_TILE_P2, balance=False)
    adj_itemsize = jnp.dtype(adjp.dtype).itemsize
    p2_bytes_per_row = out_pad * 8 + tk2 * adj_itemsize * 2   # out f32 x2 + adj x2
    tm2 = _pick_tile(n_pad, min(_MAX_TILE_P2, _row_cap(p2_bytes_per_row)),
                     balance=True)
    resident = (n_pad * out_pad * 2) <= _RESIDENT_SUPPORT_BYTES

    out = _compute_output(adjp, support, bias_pad, tm2, tk2, resident)
    return out[:n, :out_f].astype(out_dtype)


if __name__ == "__main__":
    # Small, module-consistent shapes.
    N = 16            # number of graph nodes
    in_features = 16
    out_features = 32

    key = jax.random.PRNGKey(0)
    kx, ka, kw, kb = jax.random.split(key, 4)

    # Deterministic parameter init mirroring reset_parameters():
    # uniform(-stdv, stdv) with stdv = 1/sqrt(out_features).
    stdv = 1.0 / math.sqrt(out_features)
    weight = jax.random.uniform(kw, (in_features, out_features),
                                minval=-stdv, maxval=stdv, dtype=jnp.float32)
    bias = jax.random.uniform(kb, (out_features,),
                              minval=-stdv, maxval=stdv, dtype=jnp.float32)

    # Example inputs: node features and a (dense) normalized adjacency.
    x = jax.random.normal(kx, (N, in_features), dtype=jnp.float32)
    adj_raw = jax.random.uniform(ka, (N, N), dtype=jnp.float32)
    adj = adj_raw / jnp.sum(adj_raw, axis=1, keepdims=True)  # row-normalized

    # With-bias path.
    out = graph_convolution(x, adj, weight, bias)
    out = jax.block_until_ready(out)
    ref = adj @ (x @ weight) + bias[None, :]
    assert out.shape == (N, out_features)
    # bf16 operands -> relaxed tolerance vs. the f32 reference.
    assert jnp.allclose(out, ref, atol=2e-2, rtol=2e-2)

    # No-bias path (exercises the bias-free kernel variant).
    out_nb = graph_convolution(x, adj, weight, None)
    out_nb = jax.block_until_ready(out_nb)
    ref_nb = adj @ (x @ weight)
    assert jnp.allclose(out_nb, ref_nb, atol=2e-2, rtol=2e-2)

    print("KERNEL_OK")
</pallas_src>

<mosaic_0001>
module attributes {stable_mosaic.version = 11 : i64} {
  func.func @_xw_kernel(%arg0: i32, %arg1: memref<128x128xbf16, #tpu.memory_space<vmem>>, %arg2: memref<128x128xbf16, #tpu.memory_space<vmem>>, %arg3: memref<128x128xbf16, #tpu.memory_space<vmem>>) attributes {dimension_semantics = [#tpu.dimension_semantics<parallel>], iteration_bounds = array<i64: 1>, scalar_prefetch = 0 : i64, scratch_operands = 0 : i64, tpu.core_type = #tpu.core_type<tc>, window_params = [{transform_indices = @transform_0, window_bounds = array<i64: 128, 128>}, {pipeline_mode = #tpu.pipeline_mode<synchronous>, transform_indices = @transform_1, window_bounds = array<i64: 128, 128>}, {transform_indices = @transform_2, window_bounds = array<i64: 128, 128>}]} {
    %c0 = arith.constant 0 : index
    %c0_0 = arith.constant 0 : index
    %0 = vector.load %arg1[%c0, %c0_0] : memref<128x128xbf16, #tpu.memory_space<vmem>>, vector<128x128xbf16>
    %c0_1 = arith.constant 0 : index
    %c0_2 = arith.constant 0 : index
    %1 = vector.load %arg2[%c0_1, %c0_2] : memref<128x128xbf16, #tpu.memory_space<vmem>>, vector<128x128xbf16>
    %cst = arith.constant dense<0.000000e+00> : vector<128x128xf32>
    %2 = tpu.matmul %0, %1, %cst {dimension_numbers = #tpu.dot_dimension_numbers<[1], [0], [0], [1], [0, 0, 1, 1], [], []>} : vector<128x128xbf16>, vector<128x128xbf16>, vector<128x128xf32> -> vector<128x128xf32>
    %3 = arith.truncf %2 : vector<128x128xf32> to vector<128x128xbf16>
    %c0_3 = arith.constant 0 : index
    %c0_4 = arith.constant 0 : index
    %4 = vector.load %arg3[%c0_3, %c0_4] : memref<128x128xbf16, #tpu.memory_space<vmem>>, vector<128x128xbf16>
    tpu.vector_store %arg3[%c0_3, %c0_4], %3 {strides = array<i32>} : memref<128x128xbf16, #tpu.memory_space<vmem>>, vector<128x128xbf16>,
    return
  }
  func.func @transform_0(%arg0: i32) -> (i32, i32) {
    %c0_i32 = arith.constant 0 : i32
    %c0_i32_0 = arith.constant 0 : i32
    return %arg0, %c0_i32 : i32, i32
  }
  func.func @transform_1(%arg0: i32) -> (i32, i32) {
    %c0_i32 = arith.constant 0 : i32
    %c0_i32_0 = arith.constant 0 : i32
    %c0_i32_1 = arith.constant 0 : i32
    return %c0_i32, %c0_i32_0 : i32, i32
  }
  func.func @transform_2(%arg0: i32) -> (i32, i32) {
    %c0_i32 = arith.constant 0 : i32
    %c0_i32_0 = arith.constant 0 : i32
    return %arg0, %c0_i32 : i32, i32
  }
}

</mosaic_0001>

<bundles_post_ra>
// kernel: tpu_custom_call.1
= control target key start
LH: loop header
LB: loop body
LE: loop exit
PB: predicated region body
PF: predicated region fallthrough
CT: control target
= control target key end

     0   :  { %7 = vsyncpa [#allocation3], 0  ;;  %s681_s0 = inlined_call_operand.hbm [shape: bf16[128,128], index: 0, kind: input, shape index: {}]   ;;  %s682_s1 = inlined_call_operand.hbm [shape: bf16[128,128], index: 1, kind: input, shape index: {}]   ;;  %s683_s2 = inlined_call_operand.hbm [shape: bf16[128,128], index: 2, kind: output, shape index: {}]  }
   0x1   :  { %8 = vsyncpa [#allocation6], 0 }
   0x2   :  { %9 = vsyncpa [#allocation4], 0  ;;  %s616_s9 = smov [#allocation2]   ;;  %s544_s13 = scalar_lea.hbm %s681_s0, 1024 }
   0x3   :  { %s15_s10 = sshll.u32 %s616_s9, 4  ;;  %p545_p0 = scmp.ne.s32.totalorder %s681_s0, %s544_s13  ;;  %s16_s10 = int_to_ptr.vmem [resolvable:$true] %s15_s10 }
   0x4   :  { %p548_p1 = scmp.lt.u32.totalorder %s544_s13, %s681_s0 }
   0x6   :  { %p550_p2 = pnand %p548_p1, %p545_p0 }
   0x8   :  { %553 = shalt.err (!%p550_p2)
}
   0x9   :  { %s554_s18 = scalar_lea.vmem %s16_s10, 1024  ;;  %p559_p4 = scmp.lt.s32.totalorder %s16_s10, %s16_s10 }
   0xa   :  { %p555_p3 = scmp.ne.s32.totalorder %s16_s10, %s554_s18  ;;  %p560_p5 = scmp.lt.s32.totalorder %s554_s18, %s554_s18 }
   0xc   :  { %p561_p6 = por %p560_p5, %p559_p4 }
   0xe   :  { %p562_p7 = pnand %p561_p6, %p555_p3 }
  0x10   :  { %565 = shalt.err (!%p562_p7)
}
  0x11   :  { %s617_s19 = smov 64   ;;  %s618_s20 = smov 4  }
  0x12   :  { %21 = dma.hbm_to_vmem [thread:$0]  %s681_s0, 1024, %s16_s10, [#allocation3], %s617_s19, %s617_s19, %s618_s20  }
  0x13   :  { %s619_s23 = smov [#allocation5]   ;;  %s566_s27 = scalar_lea.hbm %s682_s1, 1024 }
  0x14   :  { %s27_s24 = sshll.u32 %s619_s23, 4  ;;  %p567_p8 = scmp.ne.s32.totalorder %s682_s1, %s566_s27  ;;  %s28_s24 = int_to_ptr.vmem [resolvable:$true] %s27_s24 }
  0x15   :  { %p570_p9 = scmp.lt.u32.totalorder %s566_s27, %s682_s1 }
  0x17   :  { %p572_p10 = pnand %p570_p9, %p567_p8 }
  0x19   :  { %575 = shalt.err (!%p572_p10)
}
  0x1a   :  { %s576_s4 = scalar_lea.vmem %s28_s24, 1024  ;;  %p581_p12 = scmp.lt.s32.totalorder %s28_s24, %s28_s24 }
  0x1b   :  { %p577_p11 = scmp.ne.s32.totalorder %s28_s24, %s576_s4  ;;  %p582_p13 = scmp.lt.s32.totalorder %s576_s4, %s576_s4 }
  0x1d   :  { %p583_p0 = por %p582_p13, %p581_p12 }
  0x1f   :  { %p584_p1 = pnand %p583_p0, %p577_p11 }
  0x21   :  { %587 = shalt.err (!%p584_p1)
}
  0x22   :  { %33 = dma.hbm_to_vmem [thread:$0]  %s682_s1, 1024, %s28_s24, [#allocation6], %s617_s19, %s617_s19, %s618_s20  }
  0x23   :  { %610 = dma.done.wait [#allocation3], 1024  }
  0x24   :  { %611 = vsyncadd [#allocation3], 4294966272 }
  0x25   :  { %612 = dma.done.wait [#allocation6], 1024  }
  0x26   :  { %613 = vsyncadd [#allocation6], 4294966272  ;;  %v528_v0 = vld [vmem:[#allocation5] sm:$0xff]   ;;  %v529_v1 = vld [vmem:[#allocation5 + $0x8] sm:$0xff]   ;;  %s620_s1 = smov [#allocation7]  }
  0x27   :  { %475 = vmatprep.subr.bf16.mxu0 %v528_v0  ;;  %507 = vmatprep.subr.bf16.mxu1 %v528_v0  ;;  %v530_v2 = vld [vmem:[#allocation5 + $0x10] sm:$0xff]   ;;  %v531_v3 = vld [vmem:[#allocation5 + $0x18] sm:$0xff]   ;;  %v536_v4 = vld [vmem:[#allocation2] sm:$0xff]   ;;  %s351_s6 = sshll.u32 %s620_s1, 4  ;;  %s352_s6 = int_to_ptr.vmem [resolvable:$true] %s351_s6 }
  0x28   :  { %476 = vmatpush3.bf16.msra.mxu0 %v528_v0  ;;  %515 = vmatpush3.bf16.msra.mxu1 %v528_v0  ;;  %v537_v5 = vld [vmem:[#allocation2 + $0x20] sm:$0xff]   ;;  %v533_v7 = vld [vmem:[#allocation5 + $0x28] sm:$0xff]   ;;  %v534_v8 = vld [vmem:[#allocation5 + $0x30] sm:$0xff]   ;;  %s588_s7 = scalar_lea.vmem %s352_s6, 1024  ;;  %p593_p3 = scmp.lt.s32.totalorder %s352_s6, %s352_s6 }
  0x29   :  { %477 = vmatprep.subr.bf16.mxu0 %v529_v1  ;;  %508 = vmatprep.subr.bf16.mxu1 %v529_v1  ;;  %v532_v6 = vld [vmem:[#allocation5 + $0x20] sm:$0xff]   ;;  %v535_v9 = vld [vmem:[#allocation5 + $0x38] sm:$0xff]   ;;  %v538_v10 = vld [vmem:[#allocation2 + $0x8] sm:$0xff]   ;;  %p589_p2 = scmp.ne.s32.totalorder %s352_s6, %s588_s7  ;;  %p594_p4 = scmp.lt.s32.totalorder %s588_s7, %s588_s7 }
  0x2a   :  { %491 = vmatprep.mubr.bf16.mxu0 %v536_v4  ;;  %499 = vmatprep.mubr.bf16.mxu1 %v537_v5  ;;  %v539_v11 = vld [vmem:[#allocation2 + $0x28] sm:$0xff]   ;;  %v540_v12 = vld [vmem:[#allocation2 + $0x10] sm:$0xff]   ;;  %v542_v14 = vld [vmem:[#allocation2 + $0x18] sm:$0xff]  }
  0x2b   :  { %v541_v13 = vld [vmem:[#allocation2 + $0x30] sm:$0xff]   ;;  %v543_v15 = vld [vmem:[#allocation2 + $0x38] sm:$0xff]   ;;  %p595_p5 = por %p594_p4, %p593_p3 }
  0x2c   :  { %478 = vmatpush3.bf16.msra.mxu0 %v529_v1  ;;  %516 = vmatpush3.bf16.msra.mxu1 %v529_v1 }
  0x2d   :  { %479 = vmatprep.subr.bf16.mxu0 %v530_v2  ;;  %509 = vmatprep.subr.bf16.mxu1 %v530_v2  ;;  %p596_p6 = pnand %p595_p5, %p589_p2 }
  0x30   :  { %480 = vmatpush3.bf16.msra.mxu0 %v530_v2  ;;  %517 = vmatpush3.bf16.msra.mxu1 %v530_v2 }
  0x31   :  { %481 = vmatprep.subr.bf16.mxu0 %v531_v3  ;;  %510 = vmatprep.subr.bf16.mxu1 %v531_v3 }
  0x34   :  { %482 = vmatpush3.bf16.msra.mxu0 %v531_v3  ;;  %518 = vmatpush3.bf16.msra.mxu1 %v531_v3 }
  0x35   :  { %483 = vmatprep.subr.bf16.mxu0 %v532_v6  ;;  %511 = vmatprep.subr.bf16.mxu1 %v532_v6 }
  0x38   :  { %484 = vmatpush3.bf16.msra.mxu0 %v532_v6  ;;  %519 = vmatpush3.bf16.msra.mxu1 %v532_v6 }
  0x39   :  { %485 = vmatprep.subr.bf16.mxu0 %v533_v7  ;;  %512 = vmatprep.subr.bf16.mxu1 %v533_v7 }
  0x3c   :  { %486 = vmatpush3.bf16.msra.mxu0 %v533_v7  ;;  %520 = vmatpush3.bf16.msra.mxu1 %v533_v7 }
  0x3d   :  { %487 = vmatprep.subr.bf16.mxu0 %v534_v8  ;;  %513 = vmatprep.subr.bf16.mxu1 %v534_v8 }
  0x40   :  { %488 = vmatpush3.bf16.msra.mxu0 %v534_v8  ;;  %521 = vmatpush3.bf16.msra.mxu1 %v534_v8 }
  0x41   :  { %489 = vmatprep.subr.bf16.mxu0 %v535_v9  ;;  %514 = vmatprep.subr.bf16.mxu1 %v535_v9 }
  0x44   :  { %490 = vmatpush3.bf16.msra.mxu0 %v535_v9  ;;  %522 = vmatpush3.bf16.msra.mxu1 %v535_v9 }
  0x47   :  { %492 = vmatmul.mubr.bf16.vlgmr.msra.gmra.mrb[0].mxu0 %v538_v10  ;;  %500 = vmatmul.mubr.bf16.vlgmr.msra.gmra.mrb[0].mxu1 %v539_v11 }
  0x48   :  { %495 = vmatprep.mubr.bf16.mxu0 %v540_v12  ;;  %503 = vmatprep.mubr.bf16.mxu1 %v541_v13 }
  0x4f   :  { %496 = vmatmul.mubr.bf16.gmra.mrb[4].mxu0 %v542_v14  ;;  %504 = vmatmul.mubr.bf16.gmra.mrb[4].mxu1 %v543_v15 }
 0x11a   :  { %v493_v16 = vpop.f32.mrb[0].mxu0  ;;  %v501_v17 = vpop.f32.mrb[0].mxu1 }
 0x11b   :  { %v203_v18 = vpop.f32.mrb[1].mxu0  ;;  %v235_v19 = vpop.f32.mrb[1].mxu1 }
 0x11c   :  { %v494_v20 = vpop.f32.mrb[2].mxu0  ;;  %v502_v21 = vpop.f32.mrb[2].mxu1 }
 0x11d   :  { %v420_v22 = vpack.c.bf16 %v494_v20, %v493_v16  ;;  %v440_v23 = vpack.c.bf16 %v502_v21, %v501_v17  ;;  %v206_v24 = vpop.f32.mrb[3].mxu0  ;;  %v238_v25 = vpop.f32.mrb[3].mxu1 }
 0x11e   :  { %v415_v26 = vpack.c.bf16 %v206_v24, %v203_v18  ;;  %v435_v27 = vpack.c.bf16 %v238_v25, %v235_v19 }
 0x11f   :  { %452 = vst [vmem:[#allocation7 + $0x8] sm:$0xff] %v420_v22   ;;  %456 = vst [vmem:[#allocation7 + $0x28] sm:$0xff] %v440_v23  }
 0x120   :  { %416 = vst [vmem:[#allocation7] sm:$0xff] %v415_v26   ;;  %455 = vst [vmem:[#allocation7 + $0x20] sm:$0xff] %v435_v27  }
 0x122   :  { %v497_v28 = vpop.f32.mrb[4].mxu0  ;;  %v505_v29 = vpop.f32.mrb[4].mxu1 }
 0x123   :  { %v219_v30 = vpop.f32.mrb[5].mxu0  ;;  %v251_v31 = vpop.f32.mrb[5].mxu1 }
 0x124   :  { %v498_v32 = vpop.f32.mrb[6].mxu0  ;;  %v506_v33 = vpop.f32.mrb[6].mxu1 }
 0x125   :  { %v430_v34 = vpack.c.bf16 %v498_v32, %v497_v28  ;;  %v450_v35 = vpack.c.bf16 %v506_v33, %v505_v29  ;;  %v222_v36 = vpop.f32.mrb[7].mxu0  ;;  %v254_v37 = vpop.f32.mrb[7].mxu1 }
 0x126   :  { %v425_v38 = vpack.c.bf16 %v222_v36, %v219_v30  ;;  %v445_v39 = vpack.c.bf16 %v254_v37, %v251_v31 }
 0x127   :  { %454 = vst [vmem:[#allocation7 + $0x18] sm:$0xff] %v430_v34   ;;  %458 = vst [vmem:[#allocation7 + $0x38] sm:$0xff] %v450_v35  }
 0x128   :  { %453 = vst [vmem:[#allocation7 + $0x10] sm:$0xff] %v425_v38   ;;  %457 = vst [vmem:[#allocation7 + $0x30] sm:$0xff] %v445_v39  }
 0x129   :  { %599 = shalt.err (!%p596_p6)
}
 0x12a   :  { %s600_s10 = scalar_lea.hbm %s683_s2, 1024 }
 0x12b   :  { %p601_p7 = scmp.ne.s32.totalorder %s683_s2, %s600_s10  ;;  %p604_p8 = scmp.lt.u32.totalorder %s600_s10, %s683_s2 }
 0x12d   :  { %p606_p9 = pnand %p604_p8, %p601_p7 }
 0x12f   :  { %609 = shalt.err (!%p606_p9)
}
 0x130   :  { %357 = dma.vmem_to_hbm [thread:$0]  %s352_s6, 1024, %s683_s2, [#allocation4], %s617_s19, %s617_s19, %s618_s20  }
 0x131   :  { %614 = dma.done.wait [#allocation4], 1024  }
 0x132   :  { %615 = vsyncadd [#allocation4], 4294966272 }
 0x133   :  { %361 = vsyncpa [#allocation3], 1 }
 0x134   :  { %362 = vsyncpa [#allocation6], 1 }
 0x135   :  { %363 = vsyncpa [#allocation4], 1 }

</bundles_post_ra>
